<compile_context>
chip_gen: v7x
topology: tpu7x:2x2x1
jax: 0.10.0
libtpu: 0.0.40
codegen_flags: <defaults>
</compile_context>

<pallas_src>
import jax
import jax.numpy as jnp
import numpy as np
from jax import lax
from jax.experimental import pallas as pl
from jax.experimental.pallas import tpu as pltpu

_LANE = 128


# --------------------- Kernel A: 3x3 conv (9 shifted dots) + per-step channel stats ---------------------
def conv_stats_kernel(x0_ref, x1_ref, x2_ref, w_ref, conv_ref, stats_ref):
    # x{kh}_ref : (N, 1, W+2, Cin) bf16  -- padded-input row h+kh for every image in the batch
    # w_ref     : (3, 3, Cin, Cout_pad) bf16
    # conv_ref  : (N, 1, W, Cout_pad)   bf16  -- conv output for output row h
    # stats_ref : (1, 8, Cout_pad)      f32   -- row 0: sum, row 1: sum of squares (this step only)
    n_img = conv_ref.shape[0]
    w_out = conv_ref.shape[2]
    c_out = conv_ref.shape[3]
    x_refs = (x0_ref, x1_ref, x2_ref)

    acc_list = []
    for n in range(n_img):                      # static unroll over batch
        acc = jnp.zeros((w_out, c_out), jnp.float32)
        for kh in range(3):
            row = x_refs[kh][n, 0]              # (W+2, Cin) bf16
            for kw in range(3):
                lhs = row[kw:kw + w_out, :]     # (W, Cin) static slice (sublane shift)
                acc = acc + jnp.dot(lhs, w_ref[kh, kw],
                                    preferred_element_type=jnp.float32)
        acc_list.append(acc)
    acc_all = jnp.stack(acc_list, axis=0)       # (N, W, Cout_pad) f32

    conv_ref[...] = acc_all[:, None, :, :].astype(conv_ref.dtype)

    s = jnp.sum(acc_all, axis=(0, 1))           # (Cout_pad,)  f32
    sq = jnp.sum(acc_all * acc_all, axis=(0, 1))
    pad_rows = jnp.zeros((6, c_out), jnp.float32)
    stats_ref[...] = jnp.concatenate([s[None, :], sq[None, :], pad_rows], axis=0)[None]


# --------------------------- Kernel B: fused BN affine + LeakyReLU(0.01) ---------------------------
def bn_lrelu_kernel(y_ref, scale_ref, shift_ref, o_ref):
    y = y_ref[...].astype(jnp.float32) * scale_ref[...] + shift_ref[...]
    o_ref[...] = jnp.where(y >= 0, y, 0.01 * y)


def _pick_row_tile(m, target=1024):
    """Largest multiple-of-8 divisor of m not exceeding target (falls back to m)."""
    for t in range(min(target, m), 0, -1):
        if m % t == 0 and (t % 8 == 0 or t == m):
            return t
    return m


def base_with_bn_block(x_nchw, weight, bias, gamma, beta, *, eps=1e-5):
    """Forward pass of Base_with_bn_block (up=False), BatchNorm in training mode."""
    del bias  # conv bias is mathematically cancelled by training-mode BatchNorm; kept for API parity
    N, Cin, H, W = x_nchw.shape
    Cout, Cin_w, KH, KW = weight.shape
    assert (KH, KW) == (3, 3) and Cin_w == Cin
    Cout_pad = ((Cout + _LANE - 1) // _LANE) * _LANE

    # ---- glue: NCHW -> NHWC, spatial pad, bf16 cast (halves the dominant input DMA) ----
    x_nhwc = jnp.transpose(x_nchw, (0, 2, 3, 1))                            # (N,H,W,Cin)
    x_pad = jnp.pad(x_nhwc, ((0, 0), (1, 1), (1, 1), (0, 0))).astype(jnp.bfloat16)  # (N,H+2,W+2,Cin)

    # weight (Cout,Cin,3,3) -> (3,3,Cin,Cout_pad), zero-padded lanes, bf16
    w_hwio = jnp.transpose(weight, (2, 3, 1, 0))
    w_hwio = jnp.pad(w_hwio, ((0, 0), (0, 0), (0, 0), (0, Cout_pad - Cout))).astype(jnp.bfloat16)

    cparams = pltpu.CompilerParams(
        dimension_semantics=("parallel",),
        vmem_limit_bytes=32 * 1024 * 1024,
    )

    # ---- Kernel A: conv (no im2col) + per-step channel stats; grid over output rows ----
    conv_out, stats = pl.pallas_call(
        conv_stats_kernel,
        out_shape=(
            jax.ShapeDtypeStruct((N, H, W, Cout_pad), jnp.bfloat16),   # bf16 intermediate
            jax.ShapeDtypeStruct((H, 8, Cout_pad), jnp.float32),       # per-row partial stats
        ),
        grid_spec=pltpu.PrefetchScalarGridSpec(
            num_scalar_prefetch=0,
            grid=(H,),
            in_specs=[
                pl.BlockSpec((N, 1, W + 2, Cin), lambda h: (0, h, 0, 0)),      # row h   (kh=0)
                pl.BlockSpec((N, 1, W + 2, Cin), lambda h: (0, h + 1, 0, 0)),  # row h+1 (kh=1)
                pl.BlockSpec((N, 1, W + 2, Cin), lambda h: (0, h + 2, 0, 0)),  # row h+2 (kh=2)
                pl.BlockSpec((3, 3, Cin, Cout_pad), lambda h: (0, 0, 0, 0)),   # full weights
            ],
            out_specs=[
                pl.BlockSpec((N, 1, W, Cout_pad), lambda h: (0, h, 0, 0)),
                pl.BlockSpec((1, 8, Cout_pad), lambda h: (h, 0, 0)),
            ],
        ),
        compiler_params=cparams,
    )(x_pad, x_pad, x_pad, w_hwio)

    # ---- scalar glue: fold batch statistics into a per-channel affine (var clamped >= 0) ----
    M = N * H * W
    ch_sum = jnp.sum(stats[:, 0, :], axis=0)                     # (Cout_pad,)
    ch_sq = jnp.sum(stats[:, 1, :], axis=0)
    mean = ch_sum / M
    var = jnp.maximum(ch_sq / M - mean * mean, 0.0)              # biased variance, clamped
    gamma_pad = jnp.pad(gamma.astype(jnp.float32), (0, Cout_pad - Cout))
    beta_pad = jnp.pad(beta.astype(jnp.float32), (0, Cout_pad - Cout))
    scale = (gamma_pad / jnp.sqrt(var + eps)).reshape(1, Cout_pad)
    shift = (beta_pad - mean * (gamma_pad / jnp.sqrt(var + eps))).reshape(1, Cout_pad)

    # ---- Kernel B: normalize + LeakyReLU over the flattened, lane-dense activation ----
    conv_flat = conv_out.reshape(M, Cout_pad)
    tm = _pick_row_tile(M, 1024)
    out_flat = pl.pallas_call(
        bn_lrelu_kernel,
        out_shape=jax.ShapeDtypeStruct((M, Cout_pad), jnp.float32),
        grid_spec=pltpu.PrefetchScalarGridSpec(
            num_scalar_prefetch=0,
            grid=(M // tm,),
            in_specs=[
                pl.BlockSpec((tm, Cout_pad), lambda i: (i, 0)),
                pl.BlockSpec((1, Cout_pad), lambda i: (0, 0)),
                pl.BlockSpec((1, Cout_pad), lambda i: (0, 0)),
            ],
            out_specs=pl.BlockSpec((tm, Cout_pad), lambda i: (i, 0)),
        ),
        compiler_params=cparams,
    )(conv_flat, scale, shift)

    # back to NCHW, drop channel padding (in a chain of blocks you would stay NHWC)
    out_nhwc = out_flat.reshape(N, H, W, Cout_pad)[..., :Cout]
    return jnp.transpose(out_nhwc, (0, 3, 1, 2))


def reference_forward(x_nchw, weight, bias, gamma, beta, eps=1e-5):
    """Pure-JAX reference mirroring the PyTorch module (training-mode BN).
    Conv inputs are cast through bf16 to mirror the kernel's intentional bf16 MXU inputs."""
    xb = x_nchw.astype(jnp.bfloat16).astype(jnp.float32)
    wb = weight.astype(jnp.bfloat16).astype(jnp.float32)
    conv = lax.conv_general_dilated(
        xb, wb, window_strides=(1, 1), padding=((1, 1), (1, 1)),
        dimension_numbers=("NCHW", "OIHW", "NCHW"),
    ) + bias.reshape(1, -1, 1, 1)
    mean = jnp.mean(conv, axis=(0, 2, 3), keepdims=True)
    var = jnp.mean((conv - mean) ** 2, axis=(0, 2, 3), keepdims=True)
    y = (conv - mean) / jnp.sqrt(var + eps) * gamma.reshape(1, -1, 1, 1) + beta.reshape(1, -1, 1, 1)
    return jnp.where(y >= 0, y, 0.01 * y)


if __name__ == "__main__":
    key = jax.random.PRNGKey(0)
    N, Cin, Cout, H, W = 2, 4, 8, 16, 16

    kx, kw = jax.random.split(key)
    x = jax.random.normal(kx, (N, Cin, H, W), dtype=jnp.float32)

    # kaiming_normal_(mode='fan_out', nonlinearity='relu'): std = sqrt(2 / (Cout*3*3))
    std = np.sqrt(2.0 / (Cout * 3 * 3))
    weight = jax.random.normal(kw, (Cout, Cin, 3, 3), dtype=jnp.float32) * std
    bias = jnp.zeros((Cout,), dtype=jnp.float32)    # Conv2d bias init = 0
    gamma = jnp.ones((Cout,), dtype=jnp.float32)    # BN weight init = 1
    beta = jnp.zeros((Cout,), dtype=jnp.float32)    # BN bias init = 0

    out = jax.block_until_ready(base_with_bn_block(x, weight, bias, gamma, beta))
    ref = jax.block_until_ready(reference_forward(x, weight, bias, gamma, beta))

    # Tolerance accounts for the bf16 conv intermediate (stats accumulated in f32).
    np.testing.assert_allclose(np.asarray(out), np.asarray(ref), rtol=1e-2, atol=1e-2)

    print("KERNEL_OK")
</pallas_src>

<mosaic_0001>
module attributes {stable_mosaic.version = 11 : i64} {
  func.func @conv_stats_kernel(%arg0: i32, %arg1: memref<2x1x18x4xbf16, #tpu.memory_space<vmem>>, %arg2: memref<2x1x18x4xbf16, #tpu.memory_space<vmem>>, %arg3: memref<2x1x18x4xbf16, #tpu.memory_space<vmem>>, %arg4: memref<3x3x4x128xbf16, #tpu.memory_space<vmem>>, %arg5: memref<2x1x16x128xbf16, #tpu.memory_space<vmem>>, %arg6: memref<1x8x128xf32, #tpu.memory_space<vmem>>) attributes {dimension_semantics = [#tpu.dimension_semantics<parallel>], iteration_bounds = array<i64: 16>, scalar_prefetch = 0 : i64, scratch_operands = 0 : i64, tpu.core_type = #tpu.core_type<tc>, window_params = [{transform_indices = @transform_0, window_bounds = array<i64: 2, 1, 18, 4>}, {transform_indices = @transform_1, window_bounds = array<i64: 2, 1, 18, 4>}, {transform_indices = @transform_2, window_bounds = array<i64: 2, 1, 18, 4>}, {pipeline_mode = #tpu.pipeline_mode<synchronous>, transform_indices = @transform_3, window_bounds = array<i64: 3, 3, 4, 128>}, {transform_indices = @transform_4, window_bounds = array<i64: 2, 1, 16, 128>}, {transform_indices = @transform_5, window_bounds = array<i64: 1, 8, 128>}]} {
    %cst = arith.constant 0.000000e+00 : f32
    %0 = vector.broadcast %cst : f32 to vector<16x128xf32>
    %c0 = arith.constant 0 : index
    %c0_0 = arith.constant 0 : index
    %c0_1 = arith.constant 0 : index
    %c0_2 = arith.constant 0 : index
    %1 = vector.load %arg1[%c0, %c0_0, %c0_1, %c0_2] : memref<2x1x18x4xbf16, #tpu.memory_space<vmem>>, vector<1x1x18x4xbf16>
    %2 = vector.shape_cast %1 : vector<1x1x18x4xbf16> to vector<18x4xbf16>
    %3 = vector.extract_strided_slice %2 {offsets = [0, 0], sizes = [16, 4], strides = [1, 1]} : vector<18x4xbf16> to vector<16x4xbf16>
    %c0_3 = arith.constant 0 : index
    %c0_4 = arith.constant 0 : index
    %c0_5 = arith.constant 0 : index
    %c0_6 = arith.constant 0 : index
    %4 = vector.load %arg4[%c0_3, %c0_4, %c0_5, %c0_6] : memref<3x3x4x128xbf16, #tpu.memory_space<vmem>>, vector<1x1x4x128xbf16>
    %5 = vector.shape_cast %4 : vector<1x1x4x128xbf16> to vector<4x128xbf16>
    %cst_7 = arith.constant dense<0.000000e+00> : vector<16x128xf32>
    %6 = tpu.matmul %3, %5, %cst_7 {dimension_numbers = #tpu.dot_dimension_numbers<[1], [0], [0], [1], [0, 0, 1, 1], [], []>} : vector<16x4xbf16>, vector<4x128xbf16>, vector<16x128xf32> -> vector<16x128xf32>
    %7 = arith.addf %0, %6 : vector<16x128xf32>
    %8 = vector.extract_strided_slice %2 {offsets = [1, 0], sizes = [16, 4], strides = [1, 1]} : vector<18x4xbf16> to vector<16x4xbf16>
    %c0_8 = arith.constant 0 : index
    %c1 = arith.constant 1 : index
    %c0_9 = arith.constant 0 : index
    %c0_10 = arith.constant 0 : index
    %9 = vector.load %arg4[%c0_8, %c1, %c0_9, %c0_10] : memref<3x3x4x128xbf16, #tpu.memory_space<vmem>>, vector<1x1x4x128xbf16>
    %10 = vector.shape_cast %9 : vector<1x1x4x128xbf16> to vector<4x128xbf16>
    %cst_11 = arith.constant dense<0.000000e+00> : vector<16x128xf32>
    %11 = tpu.matmul %8, %10, %cst_11 {dimension_numbers = #tpu.dot_dimension_numbers<[1], [0], [0], [1], [0, 0, 1, 1], [], []>} : vector<16x4xbf16>, vector<4x128xbf16>, vector<16x128xf32> -> vector<16x128xf32>
    %12 = arith.addf %7, %11 : vector<16x128xf32>
    %13 = vector.extract_strided_slice %2 {offsets = [2, 0], sizes = [16, 4], strides = [1, 1]} : vector<18x4xbf16> to vector<16x4xbf16>
    %c0_12 = arith.constant 0 : index
    %c2 = arith.constant 2 : index
    %c0_13 = arith.constant 0 : index
    %c0_14 = arith.constant 0 : index
    %14 = vector.load %arg4[%c0_12, %c2, %c0_13, %c0_14] : memref<3x3x4x128xbf16, #tpu.memory_space<vmem>>, vector<1x1x4x128xbf16>
    %15 = vector.shape_cast %14 : vector<1x1x4x128xbf16> to vector<4x128xbf16>
    %cst_15 = arith.constant dense<0.000000e+00> : vector<16x128xf32>
    %16 = tpu.matmul %13, %15, %cst_15 {dimension_numbers = #tpu.dot_dimension_numbers<[1], [0], [0], [1], [0, 0, 1, 1], [], []>} : vector<16x4xbf16>, vector<4x128xbf16>, vector<16x128xf32> -> vector<16x128xf32>
    %17 = arith.addf %12, %16 : vector<16x128xf32>
    %c0_16 = arith.constant 0 : index
    %c0_17 = arith.constant 0 : index
    %c0_18 = arith.constant 0 : index
    %c0_19 = arith.constant 0 : index
    %18 = vector.load %arg2[%c0_16, %c0_17, %c0_18, %c0_19] : memref<2x1x18x4xbf16, #tpu.memory_space<vmem>>, vector<1x1x18x4xbf16>
    %19 = vector.shape_cast %18 : vector<1x1x18x4xbf16> to vector<18x4xbf16>
    %20 = vector.extract_strided_slice %19 {offsets = [0, 0], sizes = [16, 4], strides = [1, 1]} : vector<18x4xbf16> to vector<16x4xbf16>
    %c1_20 = arith.constant 1 : index
    %c0_21 = arith.constant 0 : index
    %c0_22 = arith.constant 0 : index
    %c0_23 = arith.constant 0 : index
    %21 = vector.load %arg4[%c1_20, %c0_21, %c0_22, %c0_23] : memref<3x3x4x128xbf16, #tpu.memory_space<vmem>>, vector<1x1x4x128xbf16>
    %22 = vector.shape_cast %21 : vector<1x1x4x128xbf16> to vector<4x128xbf16>
    %cst_24 = arith.constant dense<0.000000e+00> : vector<16x128xf32>
    %23 = tpu.matmul %20, %22, %cst_24 {dimension_numbers = #tpu.dot_dimension_numbers<[1], [0], [0], [1], [0, 0, 1, 1], [], []>} : vector<16x4xbf16>, vector<4x128xbf16>, vector<16x128xf32> -> vector<16x128xf32>
    %24 = arith.addf %17, %23 : vector<16x128xf32>
    %25 = vector.extract_strided_slice %19 {offsets = [1, 0], sizes = [16, 4], strides = [1, 1]} : vector<18x4xbf16> to vector<16x4xbf16>
    %c1_25 = arith.constant 1 : index
    %c1_26 = arith.constant 1 : index
    %c0_27 = arith.constant 0 : index
    %c0_28 = arith.constant 0 : index
    %26 = vector.load %arg4[%c1_25, %c1_26, %c0_27, %c0_28] : memref<3x3x4x128xbf16, #tpu.memory_space<vmem>>, vector<1x1x4x128xbf16>
    %27 = vector.shape_cast %26 : vector<1x1x4x128xbf16> to vector<4x128xbf16>
    %cst_29 = arith.constant dense<0.000000e+00> : vector<16x128xf32>
    %28 = tpu.matmul %25, %27, %cst_29 {dimension_numbers = #tpu.dot_dimension_numbers<[1], [0], [0], [1], [0, 0, 1, 1], [], []>} : vector<16x4xbf16>, vector<4x128xbf16>, vector<16x128xf32> -> vector<16x128xf32>
    %29 = arith.addf %24, %28 : vector<16x128xf32>
    %30 = vector.extract_strided_slice %19 {offsets = [2, 0], sizes = [16, 4], strides = [1, 1]} : vector<18x4xbf16> to vector<16x4xbf16>
    %c1_30 = arith.constant 1 : index
    %c2_31 = arith.constant 2 : index
    %c0_32 = arith.constant 0 : index
    %c0_33 = arith.constant 0 : index
    %31 = vector.load %arg4[%c1_30, %c2_31, %c0_32, %c0_33] : memref<3x3x4x128xbf16, #tpu.memory_space<vmem>>, vector<1x1x4x128xbf16>
    %32 = vector.shape_cast %31 : vector<1x1x4x128xbf16> to vector<4x128xbf16>
    %cst_34 = arith.constant dense<0.000000e+00> : vector<16x128xf32>
    %33 = tpu.matmul %30, %32, %cst_34 {dimension_numbers = #tpu.dot_dimension_numbers<[1], [0], [0], [1], [0, 0, 1, 1], [], []>} : vector<16x4xbf16>, vector<4x128xbf16>, vector<16x128xf32> -> vector<16x128xf32>
    %34 = arith.addf %29, %33 : vector<16x128xf32>
    %c0_35 = arith.constant 0 : index
    %c0_36 = arith.constant 0 : index
    %c0_37 = arith.constant 0 : index
    %c0_38 = arith.constant 0 : index
    %35 = vector.load %arg3[%c0_35, %c0_36, %c0_37, %c0_38] : memref<2x1x18x4xbf16, #tpu.memory_space<vmem>>, vector<1x1x18x4xbf16>
    %36 = vector.shape_cast %35 : vector<1x1x18x4xbf16> to vector<18x4xbf16>
    %37 = vector.extract_strided_slice %36 {offsets = [0, 0], sizes = [16, 4], strides = [1, 1]} : vector<18x4xbf16> to vector<16x4xbf16>
    %c2_39 = arith.constant 2 : index
    %c0_40 = arith.constant 0 : index
    %c0_41 = arith.constant 0 : index
    %c0_42 = arith.constant 0 : index
    %38 = vector.load %arg4[%c2_39, %c0_40, %c0_41, %c0_42] : memref<3x3x4x128xbf16, #tpu.memory_space<vmem>>, vector<1x1x4x128xbf16>
    %39 = vector.shape_cast %38 : vector<1x1x4x128xbf16> to vector<4x128xbf16>
    %cst_43 = arith.constant dense<0.000000e+00> : vector<16x128xf32>
    %40 = tpu.matmul %37, %39, %cst_43 {dimension_numbers = #tpu.dot_dimension_numbers<[1], [0], [0], [1], [0, 0, 1, 1], [], []>} : vector<16x4xbf16>, vector<4x128xbf16>, vector<16x128xf32> -> vector<16x128xf32>
    %41 = arith.addf %34, %40 : vector<16x128xf32>
    %42 = vector.extract_strided_slice %36 {offsets = [1, 0], sizes = [16, 4], strides = [1, 1]} : vector<18x4xbf16> to vector<16x4xbf16>
    %c2_44 = arith.constant 2 : index
    %c1_45 = arith.constant 1 : index
    %c0_46 = arith.constant 0 : index
    %c0_47 = arith.constant 0 : index
    %43 = vector.load %arg4[%c2_44, %c1_45, %c0_46, %c0_47] : memref<3x3x4x128xbf16, #tpu.memory_space<vmem>>, vector<1x1x4x128xbf16>
    %44 = vector.shape_cast %43 : vector<1x1x4x128xbf16> to vector<4x128xbf16>
    %cst_48 = arith.constant dense<0.000000e+00> : vector<16x128xf32>
    %45 = tpu.matmul %42, %44, %cst_48 {dimension_numbers = #tpu.dot_dimension_numbers<[1], [0], [0], [1], [0, 0, 1, 1], [], []>} : vector<16x4xbf16>, vector<4x128xbf16>, vector<16x128xf32> -> vector<16x128xf32>
    %46 = arith.addf %41, %45 : vector<16x128xf32>
    %47 = vector.extract_strided_slice %36 {offsets = [2, 0], sizes = [16, 4], strides = [1, 1]} : vector<18x4xbf16> to vector<16x4xbf16>
    %c2_49 = arith.constant 2 : index
    %c2_50 = arith.constant 2 : index
    %c0_51 = arith.constant 0 : index
    %c0_52 = arith.constant 0 : index
    %48 = vector.load %arg4[%c2_49, %c2_50, %c0_51, %c0_52] : memref<3x3x4x128xbf16, #tpu.memory_space<vmem>>, vector<1x1x4x128xbf16>
    %49 = vector.shape_cast %48 : vector<1x1x4x128xbf16> to vector<4x128xbf16>
    %cst_53 = arith.constant dense<0.000000e+00> : vector<16x128xf32>
    %50 = tpu.matmul %47, %49, %cst_53 {dimension_numbers = #tpu.dot_dimension_numbers<[1], [0], [0], [1], [0, 0, 1, 1], [], []>} : vector<16x4xbf16>, vector<4x128xbf16>, vector<16x128xf32> -> vector<16x128xf32>
    %51 = arith.addf %46, %50 : vector<16x128xf32>
    %cst_54 = arith.constant 0.000000e+00 : f32
    %52 = vector.broadcast %cst_54 : f32 to vector<16x128xf32>
    %c1_55 = arith.constant 1 : index
    %c0_56 = arith.constant 0 : index
    %c0_57 = arith.constant 0 : index
    %c0_58 = arith.constant 0 : index
    %53 = vector.load %arg1[%c1_55, %c0_56, %c0_57, %c0_58] : memref<2x1x18x4xbf16, #tpu.memory_space<vmem>>, vector<1x1x18x4xbf16>
    %54 = vector.shape_cast %53 : vector<1x1x18x4xbf16> to vector<18x4xbf16>
    %55 = vector.extract_strided_slice %54 {offsets = [0, 0], sizes = [16, 4], strides = [1, 1]} : vector<18x4xbf16> to vector<16x4xbf16>
    %c0_59 = arith.constant 0 : index
    %c0_60 = arith.constant 0 : index
    %c0_61 = arith.constant 0 : index
    %c0_62 = arith.constant 0 : index
    %56 = vector.load %arg4[%c0_59, %c0_60, %c0_61, %c0_62] : memref<3x3x4x128xbf16, #tpu.memory_space<vmem>>, vector<1x1x4x128xbf16>
    %57 = vector.shape_cast %56 : vector<1x1x4x128xbf16> to vector<4x128xbf16>
    %cst_63 = arith.constant dense<0.000000e+00> : vector<16x128xf32>
    %58 = tpu.matmul %55, %57, %cst_63 {dimension_numbers = #tpu.dot_dimension_numbers<[1], [0], [0], [1], [0, 0, 1, 1], [], []>} : vector<16x4xbf16>, vector<4x128xbf16>, vector<16x128xf32> -> vector<16x128xf32>
    %59 = arith.addf %52, %58 : vector<16x128xf32>
    %60 = vector.extract_strided_slice %54 {offsets = [1, 0], sizes = [16, 4], strides = [1, 1]} : vector<18x4xbf16> to vector<16x4xbf16>
    %c0_64 = arith.constant 0 : index
    %c1_65 = arith.constant 1 : index
    %c0_66 = arith.constant 0 : index
    %c0_67 = arith.constant 0 : index
    %61 = vector.load %arg4[%c0_64, %c1_65, %c0_66, %c0_67] : memref<3x3x4x128xbf16, #tpu.memory_space<vmem>>, vector<1x1x4x128xbf16>
    %62 = vector.shape_cast %61 : vector<1x1x4x128xbf16> to vector<4x128xbf16>
    %cst_68 = arith.constant dense<0.000000e+00> : vector<16x128xf32>
    %63 = tpu.matmul %60, %62, %cst_68 {dimension_numbers = #tpu.dot_dimension_numbers<[1], [0], [0], [1], [0, 0, 1, 1], [], []>} : vector<16x4xbf16>, vector<4x128xbf16>, vector<16x128xf32> -> vector<16x128xf32>
    %64 = arith.addf %59, %63 : vector<16x128xf32>
    %65 = vector.extract_strided_slice %54 {offsets = [2, 0], sizes = [16, 4], strides = [1, 1]} : vector<18x4xbf16> to vector<16x4xbf16>
    %c0_69 = arith.constant 0 : index
    %c2_70 = arith.constant 2 : index
    %c0_71 = arith.constant 0 : index
    %c0_72 = arith.constant 0 : index
    %66 = vector.load %arg4[%c0_69, %c2_70, %c0_71, %c0_72] : memref<3x3x4x128xbf16, #tpu.memory_space<vmem>>, vector<1x1x4x128xbf16>
    %67 = vector.shape_cast %66 : vector<1x1x4x128xbf16> to vector<4x128xbf16>
    %cst_73 = arith.constant dense<0.000000e+00> : vector<16x128xf32>
    %68 = tpu.matmul %65, %67, %cst_73 {dimension_numbers = #tpu.dot_dimension_numbers<[1], [0], [0], [1], [0, 0, 1, 1], [], []>} : vector<16x4xbf16>, vector<4x128xbf16>, vector<16x128xf32> -> vector<16x128xf32>
    %69 = arith.addf %64, %68 : vector<16x128xf32>
    %c1_74 = arith.constant 1 : index
    %c0_75 = arith.constant 0 : index
    %c0_76 = arith.constant 0 : index
    %c0_77 = arith.constant 0 : index
    %70 = vector.load %arg2[%c1_74, %c0_75, %c0_76, %c0_77] : memref<2x1x18x4xbf16, #tpu.memory_space<vmem>>, vector<1x1x18x4xbf16>
    %71 = vector.shape_cast %70 : vector<1x1x18x4xbf16> to vector<18x4xbf16>
    %72 = vector.extract_strided_slice %71 {offsets = [0, 0], sizes = [16, 4], strides = [1, 1]} : vector<18x4xbf16> to vector<16x4xbf16>
    %c1_78 = arith.constant 1 : index
    %c0_79 = arith.constant 0 : index
    %c0_80 = arith.constant 0 : index
    %c0_81 = arith.constant 0 : index
    %73 = vector.load %arg4[%c1_78, %c0_79, %c0_80, %c0_81] : memref<3x3x4x128xbf16, #tpu.memory_space<vmem>>, vector<1x1x4x128xbf16>
    %74 = vector.shape_cast %73 : vector<1x1x4x128xbf16> to vector<4x128xbf16>
    %cst_82 = arith.constant dense<0.000000e+00> : vector<16x128xf32>
    %75 = tpu.matmul %72, %74, %cst_82 {dimension_numbers = #tpu.dot_dimension_numbers<[1], [0], [0], [1], [0, 0, 1, 1], [], []>} : vector<16x4xbf16>, vector<4x128xbf16>, vector<16x128xf32> -> vector<16x128xf32>
    %76 = arith.addf %69, %75 : vector<16x128xf32>
    %77 = vector.extract_strided_slice %71 {offsets = [1, 0], sizes = [16, 4], strides = [1, 1]} : vector<18x4xbf16> to vector<16x4xbf16>
    %c1_83 = arith.constant 1 : index
    %c1_84 = arith.constant 1 : index
    %c0_85 = arith.constant 0 : index
    %c0_86 = arith.constant 0 : index
    %78 = vector.load %arg4[%c1_83, %c1_84, %c0_85, %c0_86] : memref<3x3x4x128xbf16, #tpu.memory_space<vmem>>, vector<1x1x4x128xbf16>
    %79 = vector.shape_cast %78 : vector<1x1x4x128xbf16> to vector<4x128xbf16>
    %cst_87 = arith.constant dense<0.000000e+00> : vector<16x128xf32>
    %80 = tpu.matmul %77, %79, %cst_87 {dimension_numbers = #tpu.dot_dimension_numbers<[1], [0], [0], [1], [0, 0, 1, 1], [], []>} : vector<16x4xbf16>, vector<4x128xbf16>, vector<16x128xf32> -> vector<16x128xf32>
    %81 = arith.addf %76, %80 : vector<16x128xf32>
    %82 = vector.extract_strided_slice %71 {offsets = [2, 0], sizes = [16, 4], strides = [1, 1]} : vector<18x4xbf16> to vector<16x4xbf16>
    %c1_88 = arith.constant 1 : index
    %c2_89 = arith.constant 2 : index
    %c0_90 = arith.constant 0 : index
    %c0_91 = arith.constant 0 : index
    %83 = vector.load %arg4[%c1_88, %c2_89, %c0_90, %c0_91] : memref<3x3x4x128xbf16, #tpu.memory_space<vmem>>, vector<1x1x4x128xbf16>
    %84 = vector.shape_cast %83 : vector<1x1x4x128xbf16> to vector<4x128xbf16>
    %cst_92 = arith.constant dense<0.000000e+00> : vector<16x128xf32>
    %85 = tpu.matmul %82, %84, %cst_92 {dimension_numbers = #tpu.dot_dimension_numbers<[1], [0], [0], [1], [0, 0, 1, 1], [], []>} : vector<16x4xbf16>, vector<4x128xbf16>, vector<16x128xf32> -> vector<16x128xf32>
    %86 = arith.addf %81, %85 : vector<16x128xf32>
    %c1_93 = arith.constant 1 : index
    %c0_94 = arith.constant 0 : index
    %c0_95 = arith.constant 0 : index
    %c0_96 = arith.constant 0 : index
    %87 = vector.load %arg3[%c1_93, %c0_94, %c0_95, %c0_96] : memref<2x1x18x4xbf16, #tpu.memory_space<vmem>>, vector<1x1x18x4xbf16>
    %88 = vector.shape_cast %87 : vector<1x1x18x4xbf16> to vector<18x4xbf16>
    %89 = vector.extract_strided_slice %88 {offsets = [0, 0], sizes = [16, 4], strides = [1, 1]} : vector<18x4xbf16> to vector<16x4xbf16>
    %c2_97 = arith.constant 2 : index
    %c0_98 = arith.constant 0 : index
    %c0_99 = arith.constant 0 : index
    %c0_100 = arith.constant 0 : index
    %90 = vector.load %arg4[%c2_97, %c0_98, %c0_99, %c0_100] : memref<3x3x4x128xbf16, #tpu.memory_space<vmem>>, vector<1x1x4x128xbf16>
    %91 = vector.shape_cast %90 : vector<1x1x4x128xbf16> to vector<4x128xbf16>
    %cst_101 = arith.constant dense<0.000000e+00> : vector<16x128xf32>
    %92 = tpu.matmul %89, %91, %cst_101 {dimension_numbers = #tpu.dot_dimension_numbers<[1], [0], [0], [1], [0, 0, 1, 1], [], []>} : vector<16x4xbf16>, vector<4x128xbf16>, vector<16x128xf32> -> vector<16x128xf32>
    %93 = arith.addf %86, %92 : vector<16x128xf32>
    %94 = vector.extract_strided_slice %88 {offsets = [1, 0], sizes = [16, 4], strides = [1, 1]} : vector<18x4xbf16> to vector<16x4xbf16>
    %c2_102 = arith.constant 2 : index
    %c1_103 = arith.constant 1 : index
    %c0_104 = arith.constant 0 : index
    %c0_105 = arith.constant 0 : index
    %95 = vector.load %arg4[%c2_102, %c1_103, %c0_104, %c0_105] : memref<3x3x4x128xbf16, #tpu.memory_space<vmem>>, vector<1x1x4x128xbf16>
    %96 = vector.shape_cast %95 : vector<1x1x4x128xbf16> to vector<4x128xbf16>
    %cst_106 = arith.constant dense<0.000000e+00> : vector<16x128xf32>
    %97 = tpu.matmul %94, %96, %cst_106 {dimension_numbers = #tpu.dot_dimension_numbers<[1], [0], [0], [1], [0, 0, 1, 1], [], []>} : vector<16x4xbf16>, vector<4x128xbf16>, vector<16x128xf32> -> vector<16x128xf32>
    %98 = arith.addf %93, %97 : vector<16x128xf32>
    %99 = vector.extract_strided_slice %88 {offsets = [2, 0], sizes = [16, 4], strides = [1, 1]} : vector<18x4xbf16> to vector<16x4xbf16>
    %c2_107 = arith.constant 2 : index
    %c2_108 = arith.constant 2 : index
    %c0_109 = arith.constant 0 : index
    %c0_110 = arith.constant 0 : index
    %100 = vector.load %arg4[%c2_107, %c2_108, %c0_109, %c0_110] : memref<3x3x4x128xbf16, #tpu.memory_space<vmem>>, vector<1x1x4x128xbf16>
    %101 = vector.shape_cast %100 : vector<1x1x4x128xbf16> to vector<4x128xbf16>
    %cst_111 = arith.constant dense<0.000000e+00> : vector<16x128xf32>
    %102 = tpu.matmul %99, %101, %cst_111 {dimension_numbers = #tpu.dot_dimension_numbers<[1], [0], [0], [1], [0, 0, 1, 1], [], []>} : vector<16x4xbf16>, vector<4x128xbf16>, vector<16x128xf32> -> vector<16x128xf32>
    %103 = arith.addf %98, %102 : vector<16x128xf32>
    %104 = vector.shape_cast %51 : vector<16x128xf32> to vector<1x16x128xf32>
    %105 = vector.shape_cast %103 : vector<16x128xf32> to vector<1x16x128xf32>
    %106 = tpu.concatenate %104, %105 in 0 : vector<1x16x128xf32>, vector<1x16x128xf32> -> vector<2x16x128xf32>
    %107 = vector.shape_cast %106 : vector<2x16x128xf32> to vector<2x1x16x128xf32>
    %108 = arith.truncf %107 : vector<2x1x16x128xf32> to vector<2x1x16x128xbf16>
    %c0_112 = arith.constant 0 : index
    %c0_113 = arith.constant 0 : index
    %c0_114 = arith.constant 0 : index
    %c0_115 = arith.constant 0 : index
    %109 = vector.load %arg5[%c0_112, %c0_113, %c0_114, %c0_115] : memref<2x1x16x128xbf16, #tpu.memory_space<vmem>>, vector<2x1x16x128xbf16>
    tpu.vector_store %arg5[%c0_112, %c0_113, %c0_114, %c0_115], %108 {strides = array<i32>} : memref<2x1x16x128xbf16, #tpu.memory_space<vmem>>, vector<2x1x16x128xbf16>,
    %cst_116 = arith.constant dense<0.000000e+00> : vector<128xf32>
    %110 = vector.multi_reduction <add>, %106, %cst_116 [0, 1] : vector<2x16x128xf32> to vector<128xf32>
    %111 = arith.mulf %106, %106 : vector<2x16x128xf32>
    %cst_117 = arith.constant dense<0.000000e+00> : vector<128xf32>
    %112 = vector.multi_reduction <add>, %111, %cst_117 [0, 1] : vector<2x16x128xf32> to vector<128xf32>
    %cst_118 = arith.constant 0.000000e+00 : f32
    %113 = vector.broadcast %cst_118 : f32 to vector<6x128xf32>
    %114 = vector.shape_cast %110 : vector<128xf32> to vector<1x128xf32>
    %115 = vector.shape_cast %112 : vector<128xf32> to vector<1x128xf32>
    %116 = tpu.concatenate %114, %115, %113 in 0 : vector<1x128xf32>, vector<1x128xf32>, vector<6x128xf32> -> vector<8x128xf32>
    %117 = vector.shape_cast %116 : vector<8x128xf32> to vector<1x8x128xf32>
    %c0_119 = arith.constant 0 : index
    %c0_120 = arith.constant 0 : index
    %c0_121 = arith.constant 0 : index
    %118 = vector.load %arg6[%c0_119, %c0_120, %c0_121] : memref<1x8x128xf32, #tpu.memory_space<vmem>>, vector<1x8x128xf32>
    tpu.vector_store %arg6[%c0_119, %c0_120, %c0_121], %117 {strides = array<i32>} : memref<1x8x128xf32, #tpu.memory_space<vmem>>, vector<1x8x128xf32>,
    return
  }
  func.func @transform_0(%arg0: i32) -> (i32, i32, i32, i32) {
    %c0_i32 = arith.constant 0 : i32
    %c0_i32_0 = arith.constant 0 : i32
    %c0_i32_1 = arith.constant 0 : i32
    %c0_i32_2 = arith.constant 0 : i32
    return %c0_i32, %arg0, %c0_i32_0, %c0_i32_1 : i32, i32, i32, i32
  }
  func.func @transform_1(%arg0: i32) -> (i32, i32, i32, i32) {
    %c1_i32 = arith.constant 1 : i32
    %0 = arith.addi %arg0, %c1_i32 : i32
    %c0_i32 = arith.constant 0 : i32
    %c0_i32_0 = arith.constant 0 : i32
    %c0_i32_1 = arith.constant 0 : i32
    %c0_i32_2 = arith.constant 0 : i32
    return %c0_i32, %0, %c0_i32_0, %c0_i32_1 : i32, i32, i32, i32
  }
  func.func @transform_2(%arg0: i32) -> (i32, i32, i32, i32) {
    %c2_i32 = arith.constant 2 : i32
    %0 = arith.addi %arg0, %c2_i32 : i32
    %c0_i32 = arith.constant 0 : i32
    %c0_i32_0 = arith.constant 0 : i32
    %c0_i32_1 = arith.constant 0 : i32
    %c0_i32_2 = arith.constant 0 : i32
    return %c0_i32, %0, %c0_i32_0, %c0_i32_1 : i32, i32, i32, i32
  }
  func.func @transform_3(%arg0: i32) -> (i32, i32, i32, i32) {
    %c0_i32 = arith.constant 0 : i32
    %c0_i32_0 = arith.constant 0 : i32
    %c0_i32_1 = arith.constant 0 : i32
    %c0_i32_2 = arith.constant 0 : i32
    %c0_i32_3 = arith.constant 0 : i32
    return %c0_i32, %c0_i32_0, %c0_i32_1, %c0_i32_2 : i32, i32, i32, i32
  }
  func.func @transform_4(%arg0: i32) -> (i32, i32, i32, i32) {
    %c0_i32 = arith.constant 0 : i32
    %c0_i32_0 = arith.constant 0 : i32
    %c0_i32_1 = arith.constant 0 : i32
    %c0_i32_2 = arith.constant 0 : i32
    return %c0_i32, %arg0, %c0_i32_0, %c0_i32_1 : i32, i32, i32, i32
  }
  func.func @transform_5(%arg0: i32) -> (i32, i32, i32) {
    %c0_i32 = arith.constant 0 : i32
    %c0_i32_0 = arith.constant 0 : i32
    %c0_i32_1 = arith.constant 0 : i32
    return %arg0, %c0_i32, %c0_i32_0 : i32, i32, i32
  }
}

</mosaic_0001>

<bundles_post_ra>
// kernel: tpu_custom_call.1
= control target key start
LH: loop header
LB: loop body
LE: loop exit
PB: predicated region body
PF: predicated region fallthrough
CT: control target
= control target key end

     0   :  { %s2674_s0 = inlined_call_operand.vmem [shape: bf16[2,18,18,4], index: 0, kind: input, shape index: {}]   ;;  %s2675_s1 = inlined_call_operand.vmem [shape: bf16[2,18,18,4], index: 1, kind: input, shape index: {}]   ;;  %s2676_s2 = inlined_call_operand.vmem [shape: bf16[2,18,18,4], index: 2, kind: input, shape index: {}]   ;;  %s2677_s3 = inlined_call_operand.vmem [shape: bf16[3,3,4,128], index: 3, kind: input, shape index: {}]   ;;  %s2678_s4 = inlined_call_operand.hbm [shape: bf16[2,16,16,128], index: 4, kind: output, shape index: {0}]   ;;  %s2679_s5 = inlined_call_operand.hbm [shape: f32[16,8,128], index: 5, kind: output, shape index: {1}]  }
   0x1   :  { %2681 = sst [smem:[#allocation13_spill]] %s2674_s0 }
   0x2   :  { %2682 = sst [smem:[#allocation14_spill]] %s2675_s1 }
   0x3   :  { %2683 = sst [smem:[#allocation15_spill]] %s2676_s2 }
   0x4   :  { %11 = vsyncpa [#allocation6], 0 }
   0x5   :  { %13 = vsyncpa [#allocation6 + $0x1], 0 }
   0x6   :  { %14 = vsyncpa [#allocation8], 0 }
   0x7   :  { %16 = vsyncpa [#allocation8 + $0x1], 0  ;;  %s2286_s18 = smov 0   ;;  %s2288_s19 = smov 0  }
   0x8   :  { %s2290_s20 = smov 0   ;;  %s2292_s21 = smov 0  }
   0x9   :  { %s2294_s22 = smov 0   ;;  %s2296_s23 = smov 0  }
   0xa   :  { %s2298_s24 = smov 0   ;;  %s2300_s25 = smov 0  }
   0xb LB: > { %s2680_s26 = sadd.s32 4294967295, %s2244_s25   ;;  %s1735_s27 = sadd.s32 4294967294, %s2244_s25   ;;  %s2244_s25 = sphi %s2300_s25, %s2701_s25   ;;  %s2240_s24 = sphi %s2298_s24, %s2700_s24   ;;  %s2236_s23 = sphi %s2296_s23, %s2699_s23   ;;  %s2232_s22 = sphi %s2294_s22, %s2698_s22   ;;  %s2228_s21 = sphi %s2292_s21, %s2697_s21   ;;  %s2224_s20 = sphi %s2290_s20, %s2696_s20   ;;  %s2220_s19 = sphi %s2288_s19, %s2695_s19   ;;  %s2216_s18 = sphi %s2286_s18, %s2694_s18  }
   0xc   : > { %s2329_s28 = sadd.s32 1, %s2244_s25   ;;  %s29_s29 = sadd.s32 1, %s2240_s24 }
   0xd   : > { %s26_s30 = ssub.s32 %s2244_s25, %s2329_s28  ;;  %p36_p0 = scmp.ne.s32.totalorder %s2240_s24, %s2236_s23 }
   0xe   : > { %p27_p1 = scmp.eq.s32.totalorder %s26_s30, 0  ;;  %p37_p2 = scmp.eq.s32.totalorder %s2244_s25, 0 }
   0xf   : > { %s53_s6 = sadd.s32 1, %s2329_s28  ;;  %s57_s7 = sadd.s32 1, %s2232_s22 }
  0x10   : > { %s2340_s8 = scalar_select %p27_p1, %s2240_s24, %s29_s29  }
  0x11   : > { %p2347_p3 = por %p37_p2, %p36_p0  ;;  %s54_s10 = ssub.s32 %s2329_s28, %s53_s6 }
  0x12   : > { %p55_p4 = scmp.eq.s32.totalorder %s54_s10, 0  ;;  %p64_p5 = scmp.ne.s32.totalorder %s2232_s22, %s2228_s21 }
  0x13   : > { %s80_s11 = sadd.s32 2, %s2244_s25  ;;  %s81_s12 = sadd.s32 2, %s2329_s28 }
  0x14   : > { %s2357_s13 = scalar_select %p55_p4, %s2232_s22, %s57_s7  }
  0x15   : > { %p2361_p6 = por %p64_p5, %p37_p2  ;;  %s82_s15 = ssub.s32 %s80_s11, %s81_s12 }
  0x16   : > { %p83_p7 = scmp.eq.s32.totalorder %s82_s15, 0  ;;  %s85_s16 = sadd.s32 1, %s2224_s20 }
  0x17   : > { %p92_p8 = scmp.ne.s32.totalorder %s2224_s20, %s2220_s19  ;;  %p143_p9 = scmp.eq.s32.totalorder %s2680_s26, 15 }
  0x18   : > { %s2371_s17 = scalar_select %p83_p7, %s2224_s20, %s85_s16  }
  0x19   : > { %p2375_p10 = por %p92_p8, %p37_p2  ;;  %p2382_p11 = por %p143_p9, %p36_p0 }
  0x1a   : > { %p148_p12 = scmp.ne.s32.totalorder %s2236_s23, %s2216_s18  ;;  %p149_p13 = scmp.eq.s32.totalorder %s1735_s27, 15 }
  0x1b   : > { %p1737_p4 = scmp.ge.s32.totalorder %s2244_s25, 16 }
  0x1c   : > { %p2388_p1 = por %p149_p13, %p148_p12 }
  0x1d   : > { %194 = sbr.rel (%p1737_p4) target bundleno = 69 (0x45), region = 20 }
  0x24   : > { %197 = sbr.rel (!%p2347_p3) target bundleno = 47 (0x2f), region = 24  ;;  %s199_s7 = sand.u32 (%p2347_p3), 1, %s2240_s24  }
  0x25   : > { %s2037_s10 = smul.u32 (%p2347_p3), 12, %s2244_s25  ;;  %s2689_s0 = sld [smem:[#allocation13_spill]] (%p2347_p3) }
  0x26   : > { %s2036_s11 = smul.u32 (%p2347_p3), 24, %s199_s7 }
  0x28   : > { %s201_s27 = scalar_lea.vmem (%p2347_p3), [#allocation2], %s2036_s11 }
  0x2b   : > { %s204_s16 = scalar_lea.vmem %s2689_s0, %s2037_s10 }
  0x2c   : > { %v220_v0 = vld [vmem:[%s204_s16] sm:$0xff]   ;;  %v224_v1 = vld [vmem:[%s204_s16 + $0x8] sm:$0xf]  ;;  %v226_v2 = vld [vmem:[%s204_s16 + $0xd8] sm:$0xff]  }
  0x2d   : > { %221 = vst [vmem:[%s201_s27] sm:$0xff] %v220_v0   ;;  %225 = vst [vmem:[%s201_s27 + $0x8] sm:$0xf] %v224_v1  ;;  %v230_v3 = vld [vmem:[%s204_s16 + $0xe0] sm:$0xf] }
  0x2e   : > { %227 = vst [vmem:[%s201_s27 + $0xc] sm:$0xff] %v226_v2   ;;  %231 = vst [vmem:[%s201_s27 + $0x14] sm:$0xf] %v230_v3 }
  0x2f PF: > { %266 = sbr.rel (!%p2361_p6) target bundleno = 58 (0x3a), region = 65  ;;  %s268_s9 = sand.u32 (%p2361_p6), 1, %s2232_s22  }
  0x30   : > { %s1639_s7 = smul.u32 (%p2361_p6), 12, %s2244_s25  ;;  %s2690_s1 = sld [smem:[#allocation14_spill]] (%p2361_p6) }
  0x31   : > { %s2038_s26 = smul.u32 (%p2361_p6), 24, %s268_s9 }
  0x33   : > { %s270_s11 = scalar_lea.vmem (%p2361_p6), [#allocation3], %s2038_s26 }
  0x36   : > { %s1640_s15 = scalar_lea.vmem %s2690_s1, %s1639_s7 }
  0x37   : > { %v1739_v4 = vld [vmem:[%s1640_s15 + $0xc] sm:$0xff]   ;;  %v1741_v5 = vld [vmem:[%s1640_s15 + $0x14] sm:$0xf]  ;;  %v1742_v6 = vld [vmem:[%s1640_s15 + $0xe4] sm:$0xff]  }
  0x38   : > { %291 = vst [vmem:[%s270_s11] sm:$0xff] %v1739_v4   ;;  %295 = vst [vmem:[%s270_s11 + $0x8] sm:$0xf] %v1741_v5  ;;  %v1744_v7 = vld [vmem:[%s1640_s15 + $0xec] sm:$0xf] }
  0x39   : > { %297 = vst [vmem:[%s270_s11 + $0xc] sm:$0xff] %v1742_v6   ;;  %301 = vst [vmem:[%s270_s11 + $0x14] sm:$0xf] %v1744_v7 }
  0x3a PF: > { %336 = sbr.rel (!%p2375_p10) target bundleno = 69 (0x45), region = 106  ;;  %s338_s14 = sand.u32 (%p2375_p10), 1, %s2224_s20  }
  0x3b   : > { %s1644_s16 = smul.u32 (%p2375_p10), 12, %s2244_s25  ;;  %s2691_s2 = sld [smem:[#allocation15_spill]] (%p2375_p10) }
  0x3c   : > { %s2039_s27 = smul.u32 (%p2375_p10), 24, %s338_s14 }
  0x3e   : > { %s340_s26 = scalar_lea.vmem (%p2375_p10), [#allocation4], %s2039_s27 }
  0x41   : > { %s1645_s12 = scalar_lea.vmem %s2691_s2, %s1644_s16 }
  0x42   : > { %v1745_v8 = vld [vmem:[%s1645_s12 + $0x18] sm:$0xff]   ;;  %v1747_v9 = vld [vmem:[%s1645_s12 + $0x20] sm:$0xf]  ;;  %v1748_v10 = vld [vmem:[%s1645_s12 + $0xf0] sm:$0xff]  }
  0x43   : > { %361 = vst [vmem:[%s340_s26] sm:$0xff] %v1745_v8   ;;  %365 = vst [vmem:[%s340_s26 + $0x8] sm:$0xf] %v1747_v9  ;;  %v1750_v11 = vld [vmem:[%s1645_s12 + $0xf8] sm:$0xf] }
  0x44   : > { %367 = vst [vmem:[%s340_s26 + $0xc] sm:$0xff] %v1748_v10   ;;  %371 = vst [vmem:[%s340_s26 + $0x14] sm:$0xf] %v1750_v11 }
  0x45 PF: > { %p1751_p0 = scmp.ge.s32.totalorder %s2244_s25, 1  ;;  %p405_p2 = scmp.lt.s32.totalorder %s2244_s25, 17 }
  0x47   : > { %p406_p3 = pnand %p1751_p0, %p405_p2 }
  0x48   : > { %v1754_v12 = vld [vmem:[%s2677_s3 + $0x2] sm:$0x3] (!%p406_p3)  ;;  %vm500_vm0 = vcmask (!%p406_p3), 1041408   ;;  %s2420_s15 = sand.u32 (!%p406_p3), 1, %s2236_s23   ;;  %v2246_v13 = vmov (!%p406_p3), 0.0   ;;  %vm2247_vm1 = vmmov (!%p406_p3), 0  }
  0x49   : > { %409 = sbr.rel (%p406_p3) target bundleno = 452 (0x1c4), region = 147  ;;  %1864 = vmatprep.subr.bf16.mxu0 (!%p406_p3), %v2246_v13  ;;  %v502_v14 = vsel (!%p406_p3), %vm500_vm0, %v1754_v12, 0  ;;  %1918 = vmatprep.subr.bf16.mxu1 (!%p406_p3), %v2246_v13  ;;  %s419_s14 = sand.u32 (!%p406_p3), 1, %s2228_s21   ;;  %v472_v26 = vld [vmem:[%s2677_s3] sm:$0x3] (!%p406_p3)  ;;  %vm496_vm3 = vcmask (!%p406_p3), 31744  }
  0x4a   : > { %s2040_s11 = smul.u32 (!%p406_p3), 24, %s2420_s15  ;;  %1865 = vmatpush3.bf16.msra.mxu0 (!%p406_p3), %v502_v14  ;;  %1919 = vmatpush3.bf16.msra.mxu1 (!%p406_p3), %v502_v14  ;;  %vm483_vm2 = vsmask.f32 (!%p406_p3), 7424  ;;  %v548_v31 = vsel (!%p406_p3), %vm500_vm0, %v472_v26, 0  ;;  %s426_s12 = sand.u32 (!%p406_p3), 1, %s2220_s19   ;;  %vm593_vm4 = vcmask (!%p406_p3), 1046528  }
  0x4b   : > { %1866 = vmatprep.mubr.msk.bf16.mxu0 (!%p406_p3), %vm2247_vm1, %v2246_v13  ;;  %1870 = vmatprep.subr.bf16.mxu0 (!%p406_p3), %v2246_v13  ;;  %s2041_s21 = smul.u32 (!%p406_p3), 24, %s419_s14  ;;  %v1759_v35 = vld [vmem:[%s2677_s3 + $0x4] sm:$0x3] (!%p406_p3)  ;;  %v1761_v1 = vld [vmem:[%s2677_s3 + $0x6] sm:$0x3] (!%p406_p3)  ;;  %vm1532_vm5 = vcmask (!%p406_p3), 1040384  }
  0x4c   : > { %1920 = vmatprep.mubr.msk.bf16.mxu1 (!%p406_p3), %vm2247_vm1, %v2246_v13  ;;  %s414_s16 = scalar_lea.vmem (!%p406_p3), [#allocation2], %s2040_s11  ;;  %1924 = vmatprep.subr.bf16.mxu1 (!%p406_p3), %v2246_v13  ;;  %s2042_s26 = smul.u32 (!%p406_p3), 24, %s426_s12  ;;  %v601_v37 = vsel (!%p406_p3), %vm500_vm0, %v1759_v35, 0  ;;  %v660_v3 = vsel (!%p406_p3), %vm500_vm0, %v1761_v1, 0  ;;  %v1764_v6 = vld [vmem:[%s2677_s3 + $0x8] sm:$0x3] (!%p406_p3) }
  0x4d   : > { %v2433_v15 = vld [vmem:[%s414_s16] sm:$0xff] (!%p406_p3)   ;;  %v2435_v16 = vld [vmem:[%s414_s16 + $0x8] ss:$0 sps:$4 sm:$0x11] (!%p406_p3)   ;;  %v2437_v17 = vld [vmem:[%s414_s16 + $0xc] sm:$0xff] (!%p406_p3)   ;;  %s2450_s7 = scalar_lea.vmem (!%p406_p3), [#allocation3], %s2041_s21 }
  0x4e   : > { %v485_v18 = vshrl.u32 (!%p406_p3), %v2433_v15, 16  ;;  %v487_v19 = vshll.u32 (!%p406_p3), %v2433_v15, 16  ;;  %v492_v20 = vshll.u32 (!%p406_p3), %v2435_v16, 16  ;;  %v2442_v21 = vld [vmem:[%s414_s16 + $0x14] ss:$0 sps:$4 sm:$0x11] (!%p406_p3)  }
  0x4f   : > { %v1015_v22 = vshrl.u32 (!%p406_p3), %v2437_v17, 16  ;;  %v1017_v23 = vshll.u32 (!%p406_p3), %v2437_v17, 16  ;;  %v1022_v27 = vshll.u32 (!%p406_p3), %v2442_v21, 16  ;;  %s428_s19 = scalar_lea.vmem (!%p406_p3), [#allocation4], %s2042_s26  ;;  %v594_v61 = vrot.slane (!%p406_p3), %v2433_v15, 1  ;;  %v2138_v5 = vld [vmem:[%s2450_s7] sm:$0xff] (!%p406_p3)  }
  0x50   : > { %v489_v24 = vrot.slane %v487_v19, 1  ;;  %v494_v25 = vrot.slane %v492_v20, 1  ;;  %v2467_v36 = vld [vmem:[%s428_s19] sm:$0xff]   ;;  %v2470_v38 = vld [vmem:[%s428_s19 + $0xc] sm:$0xff]   ;;  %v595_v62 = vrot.slane %v2435_v16, 1  ;;  %v1113_v63 = vrot.slane %v2437_v17, 1 }
  0x51   : > { %v1019_v28 = vrot.slane %v1017_v23, 1  ;;  %v1024_v30 = vrot.slane %v1022_v27, 1  ;;  %v2144_v39 = vld [vmem:[%s428_s19 + $0x8] ss:$0 sps:$4 sm:$0x11]   ;;  %v888_v40 = vshrl.u32 %v2467_v36, 16 }
  0x52   : > { %v490_v29 = vor.u32 %v489_v24, %v485_v18  ;;  %v890_v41 = vshll.u32 %v2467_v36, 16  ;;  %v2145_v42 = vld [vmem:[%s428_s19 + $0x14] ss:$0 sps:$4 sm:$0x11]   ;;  %v895_v43 = vshll.u32 %v2144_v39, 16  ;;  %v1384_v44 = vshrl.u32 %v2470_v38, 16 }
  0x53   : > { %v1020_v32 = vor.u32 %v1019_v28, %v1015_v22  ;;  %v1386_v45 = vshll.u32 %v2470_v38, 16  ;;  %v950_v46 = vrot.slane %v2467_v36, 1  ;;  %v1391_v48 = vshll.u32 %v2145_v42, 16  ;;  %v2139_v7 = vld [vmem:[%s2450_s7 + $0xc] sm:$0xff]   ;;  %v1767_v24 = vld [vmem:[%s2677_s3 + $0xa] sm:$0x3] }
  0x54   : > { %v495_v33 = vsel %vm483_vm2, %v490_v29, %v494_v25  ;;  %v892_v47 = vrot.slane %v890_v41, 1  ;;  %v951_v49 = vrot.slane %v2144_v39, 1  ;;  %v1441_v50 = vrot.slane %v2470_v38, 1  ;;  %v2140_v8 = vld [vmem:[%s2450_s7 + $0x8] ss:$0 sps:$4 sm:$0x11]  }
  0x55   : > { %1867 = vmatmul.mubr.msk.bf16.vlgmr.msra.gmra.mrb[0].mxu0 %vm496_vm3, %v495_v33  ;;  %v1025_v34 = vsel %vm483_vm2, %v1020_v32, %v1024_v30  ;;  %v897_v51 = vrot.slane %v895_v43, 1  ;;  %v1388_v52 = vrot.slane %v1386_v45, 1  ;;  %v1442_v53 = vrot.slane %v2145_v42, 1  ;;  %v2141_v11 = vld [vmem:[%s2450_s7 + $0x14] ss:$0 sps:$4 sm:$0x11]  }
  0x56   : > { %1871 = vmatpush3.bf16.msra.mxu0 %v548_v31  ;;  %1921 = vmatmul.mubr.msk.bf16.vlgmr.msra.gmra.mrb[0].mxu1 %vm496_vm3, %v1025_v34  ;;  %v893_v54 = vor.u32 %v892_v47, %v888_v40  ;;  %v1393_v55 = vrot.slane %v1391_v48, 1  ;;  %v2481_v56 = vsel %vm593_vm4, %v950_v46, %v951_v49  ;;  %v1114_v0 = vrot.slane %v2442_v21, 1  ;;  %v1769_v32 = vld [vmem:[%s2677_s3 + $0xc] sm:$0x3]  ;;  %s1752_s11 = sshll.u32 %s2420_s15, 4  ;;  %s1753_s16 = sshll.u32 %s2420_s15, 3 }
  0x57   : > { %1925 = vmatpush3.bf16.msra.mxu1 %v548_v31  ;;  %1872 = vmatprep.mubr.msk.bf16.mxu0 %vm2247_vm1, %v2246_v13  ;;  %v1389_v57 = vor.u32 %v1388_v52, %v1384_v44  ;;  %v2486_v58 = vsel %vm593_vm4, %v1441_v50, %v1442_v53  ;;  %v596_v2 = vsel %vm593_vm4, %v594_v61, %v595_v62  ;;  %v712_v9 = vshll.u32 %v2138_v5, 16  ;;  %s2593_s14 = scalar_lea.vmem [#allocation5], %s1752_s11  ;;  %s465_s21 = scalar_lea.vmem [#allocation7], %s1753_s16 }
  0x58   : > { %1876 = vmatprep.subr.bf16.mxu0 %v2246_v13  ;;  %1926 = vmatprep.mubr.msk.bf16.mxu1 %vm2247_vm1, %v2246_v13  ;;  %v2491_v59 = vsel %vm483_vm2, %v893_v54, %v897_v51  ;;  %v1115_v4 = vsel %vm593_vm4, %v1113_v63, %v1114_v0  ;;  %v725_v10 = vsel %vm500_vm0, %v1764_v6, 0  ;;  %v1222_v12 = vshll.u32 %v2139_v7, 16  ;;  %s1537_s27 = scalar_lea.sflag [#allocation6], %s2420_s15 }
  0x59   : > { %1930 = vmatprep.subr.bf16.mxu1 %v2246_v13  ;;  %v2497_v60 = vsel %vm483_vm2, %v1389_v57, %v1393_v55  ;;  %v710_v14 = vshrl.u32 %v2138_v5, 16  ;;  %v717_v16 = vshll.u32 %v2140_v8, 16  ;;  %v1227_v19 = vshll.u32 %v2141_v11, 16 }
  0x5a   : > { %v1224_v18 = vrot.slane %v1222_v12, 1  ;;  %v779_v26 = vsel %vm500_vm0, %v1767_v24, 0  ;;  %v772_v28 = vrot.slane %v2138_v5, 1  ;;  %v773_v29 = vrot.slane %v2140_v8, 1 }
  0x5b   : > { %v719_v21 = vrot.slane %v717_v16, 1  ;;  %v1229_v23 = vrot.slane %v1227_v19, 1  ;;  %v1277_v30 = vrot.slane %v2139_v7, 1  ;;  %v1278_v31 = vrot.slane %v2141_v11, 1 }
  0x5c   : > { %v774_v33 = vsel %vm593_vm4, %v772_v28, %v773_v29  ;;  %v838_v34 = vsel %vm500_vm0, %v1769_v32, 0 }
  0x5d   : > { %v1279_v35 = vsel %vm593_vm4, %v1277_v30, %v1278_v31 }
  0x61   : > { %1873 = vmatmul.mubr.msk.bf16.vlgmr.msra.gmra.mrb[0].mxu0 %vm496_vm3, %v2433_v15  ;;  %v714_v15 = vrot.slane %v712_v9, 1 }
  0x62   : > { %1877 = vmatpush3.bf16.msra.mxu0 %v601_v37  ;;  %1927 = vmatmul.mubr.msk.bf16.vlgmr.msra.gmra.mrb[0].mxu1 %vm496_vm3, %v2437_v17  ;;  %v1220_v17 = vshrl.u32 %v2139_v7, 16 }
  0x63   : > { %1931 = vmatpush3.bf16.msra.mxu1 %v601_v37  ;;  %1878 = vmatprep.mubr.msk.bf16.mxu0 %vm2247_vm1, %v2246_v13  ;;  %v715_v20 = vor.u32 %v714_v15, %v710_v14  ;;  %v1772_v37 = vld [vmem:[%s2677_s3 + $0xe] sm:$0x3] }
  0x64   : > { %1882 = vmatprep.subr.bf16.mxu0 %v2246_v13  ;;  %1932 = vmatprep.mubr.msk.bf16.mxu1 %vm2247_vm1, %v2246_v13  ;;  %v1225_v22 = vor.u32 %v1224_v18, %v1220_v17  ;;  %v903_v39 = vsel %vm500_vm0, %v1772_v37, 0 }
  0x65   : > { %1936 = vmatprep.subr.bf16.mxu1 %v2246_v13  ;;  %v720_v25 = vsel %vm483_vm2, %v715_v20, %v719_v21 }
  0x66   : > { %v1230_v27 = vsel %vm483_vm2, %v1225_v22, %v1229_v23 }
  0x6d   : > { %1879 = vmatmul.mubr.msk.bf16.vlgmr.msra.gmra.mrb[0].mxu0 %vm496_vm3, %v596_v2 }
  0x6e   : > { %1883 = vmatpush3.bf16.msra.mxu0 %v660_v3  ;;  %1933 = vmatmul.mubr.msk.bf16.vlgmr.msra.gmra.mrb[0].mxu1 %vm496_vm3, %v1115_v4 }
  0x6f   : > { %1937 = vmatpush3.bf16.msra.mxu1 %v660_v3  ;;  %1884 = vmatprep.mubr.msk.bf16.mxu0 %vm2247_vm1, %v2246_v13 }
  0x70   : > { %1888 = vmatprep.subr.bf16.mxu0 %v2246_v13  ;;  %1938 = vmatprep.mubr.msk.bf16.mxu1 %vm2247_vm1, %v2246_v13 }
  0x71   : > { %1942 = vmatprep.subr.bf16.mxu1 %v2246_v13 }
  0x79   : > { %1885 = vmatmul.mubr.msk.bf16.vlgmr.msra.gmra.mrb[0].mxu0 %vm496_vm3, %v2138_v5 }
  0x7a   : > { %1889 = vmatpush3.bf16.msra.mxu0 %v725_v10  ;;  %1939 = vmatmul.mubr.msk.bf16.vlgmr.msra.gmra.mrb[0].mxu1 %vm496_vm3, %v2139_v7 }
  0x7b   : > { %1943 = vmatpush3.bf16.msra.mxu1 %v725_v10  ;;  %1890 = vmatprep.mubr.msk.bf16.mxu0 %vm2247_vm1, %v2246_v13 }
  0x7c   : > { %1894 = vmatprep.subr.bf16.mxu0 %v2246_v13  ;;  %1944 = vmatprep.mubr.msk.bf16.mxu1 %vm2247_vm1, %v2246_v13 }
  0x7d   : > { %1948 = vmatprep.subr.bf16.mxu1 %v2246_v13 }
  0x85   : > { %1891 = vmatmul.mubr.msk.bf16.vlgmr.msra.gmra.mrb[0].mxu0 %vm496_vm3, %v720_v25 }
  0x86   : > { %1895 = vmatpush3.bf16.msra.mxu0 %v779_v26  ;;  %1945 = vmatmul.mubr.msk.bf16.vlgmr.msra.gmra.mrb[0].mxu1 %vm496_vm3, %v1230_v27 }
  0x87   : > { %1949 = vmatpush3.bf16.msra.mxu1 %v779_v26  ;;  %1896 = vmatprep.mubr.msk.bf16.mxu0 %vm2247_vm1, %v2246_v13 }
  0x88   : > { %1900 = vmatprep.subr.bf16.mxu0 %v2246_v13  ;;  %1950 = vmatprep.mubr.msk.bf16.mxu1 %vm2247_vm1, %v2246_v13 }
  0x89   : > { %1954 = vmatprep.subr.bf16.mxu1 %v2246_v13 }
  0x91   : > { %1897 = vmatmul.mubr.msk.bf16.vlgmr.msra.gmra.mrb[0].mxu0 %vm496_vm3, %v774_v33 }
  0x92   : > { %1901 = vmatpush3.bf16.msra.mxu0 %v838_v34  ;;  %1951 = vmatmul.mubr.msk.bf16.vlgmr.msra.gmra.mrb[0].mxu1 %vm496_vm3, %v1279_v35 }
  0x93   : > { %1955 = vmatpush3.bf16.msra.mxu1 %v838_v34  ;;  %1902 = vmatprep.mubr.msk.bf16.mxu0 %vm2247_vm1, %v2246_v13 }
  0x94   : > { %1906 = vmatprep.subr.bf16.mxu0 %v2246_v13  ;;  %1956 = vmatprep.mubr.msk.bf16.mxu1 %vm2247_vm1, %v2246_v13 }
  0x95   : > { %1960 = vmatprep.subr.bf16.mxu1 %v2246_v13 }
  0x9d   : > { %1903 = vmatmul.mubr.msk.bf16.vlgmr.msra.gmra.mrb[0].mxu0 %vm496_vm3, %v2467_v36  ;;  %v1775_v36 = vld [vmem:[%s2677_s3 + $0x10] sm:$0x3] }
  0x9e   : > { %1907 = vmatpush3.bf16.msra.mxu0 %v903_v39  ;;  %1957 = vmatmul.mubr.msk.bf16.vlgmr.msra.gmra.mrb[0].mxu1 %vm496_vm3, %v2470_v38  ;;  %v957_v40 = vsel %vm500_vm0, %v1775_v36, 0 }
  0x9f   : > { %1961 = vmatpush3.bf16.msra.mxu1 %v903_v39  ;;  %1908 = vmatprep.mubr.msk.bf16.mxu0 %vm2247_vm1, %v2246_v13 }
  0xa0   : > { %1912 = vmatprep.subr.bf16.mxu0 %v2246_v13  ;;  %1962 = vmatprep.mubr.msk.bf16.mxu1 %vm2247_vm1, %v2246_v13 }
  0xa1   : > { %1966 = vmatprep.subr.bf16.mxu1 %v2246_v13 }
  0xa9   : > { %1909 = vmatmul.mubr.msk.bf16.vlgmr.msra.gmra.mrb[0].mxu0 %vm496_vm3, %v2491_v59 }
  0xaa   : > { %1913 = vmatpush3.bf16.msra.mxu0 %v957_v40  ;;  %1963 = vmatmul.mubr.msk.bf16.vlgmr.msra.gmra.mrb[0].mxu1 %vm496_vm3, %v2497_v60 }
  0xab   : > { %1967 = vmatpush3.bf16.msra.mxu1 %v957_v40  ;;  %1914 = vmatprep.mubr.msk.bf16.mxu0 %vm2247_vm1, %v2246_v13 }
  0xac   : > { %1968 = vmatprep.mubr.msk.bf16.mxu1 %vm2247_vm1, %v2246_v13 }
  0xb5   : > { %1915 = vmatmul.mubr.msk.bf16.vlgmr.msra.gmra.mrb[0].mxu0 %vm496_vm3, %v2481_v56 }
  0xb6   : > { %1969 = vmatmul.mubr.msk.bf16.vlgmr.msra.gmra.mrb[0].mxu1 %vm496_vm3, %v2486_v58 }
 0x188   : > { %v993_v38 = vpop.f32.mrb[0].mxu0 }
 0x189   : > { %v1481_v41 = vpop.f32.mrb[0].mxu1  ;;  %v1916_v42 = vpop.f32.mrb[1].mxu0  ;;  %v1519_v45 = vmul.f32 %v993_v38, %v993_v38 }
 0x18a   : > { %v1970_v43 = vpop.f32.mrb[1].mxu1  ;;  %v996_v44 = vpop.f32.mrb[2].mxu0  ;;  %v1521_v52 = vmul.f32 %v1481_v41, %v1481_v41 }
 0x18b   : > { %v1820_v46 = vpack.c.bf16 %v996_v44, %v993_v38  ;;  %v1510_v47 = vadd.f32 %v996_v44, %v993_v38  ;;  %v1520_v48 = vmul.f32 %v996_v44, %v996_v44  ;;  %v1484_v49 = vpop.f32.mrb[2].mxu1  ;;  %v1917_v50 = vpop.f32.mrb[3].mxu0 }
 0x18c   : > { %v1825_v51 = vpack.c.bf16 %v1484_v49, %v1481_v41  ;;  %v1971_v13 = vpop.f32.mrb[3].mxu1  ;;  %v1522_v56 = vmul.f32 %v1484_v49, %v1484_v49 }
 0x18d   : > { %1821 = vst [vmem:[%s2593_s14] sm:$0xff] %v1820_v46   ;;  %v1523_v53 = vadd.f32 %v1520_v48, %v1519_v45  ;;  %v1511_v54 = vadd.f32 %v1510_v47, %v1481_v41 }
 0x18e   : > { %1827 = vst [vmem:[%s2593_s14 + $0x8] sm:$0xff] %v1825_v51  }
 0x18f   : > { %v1512_v55 = vadd.f32 %v1511_v54, %v1484_v49  ;;  %v1524_v57 = vadd.f32 %v1523_v53, %v1521_v52 }
 0x191   : > { %v1513_v58 = vrot.slane %v1512_v55, 4  ;;  %v1525_v59 = vadd.f32 %v1524_v57, %v1522_v56 }
 0x193   : > { %v1514_v60 = vadd.f32 %v1513_v58, %v1512_v55  ;;  %v1526_v61 = vrot.slane %v1525_v59, 4 }
 0x195   : > { %v1515_v62 = vrot.slane %v1514_v60, 2  ;;  %v1527_v63 = vadd.f32 %v1526_v61, %v1525_v59 }
 0x197   : > { %v1516_v0 = vadd.f32 %v1515_v62, %v1514_v60  ;;  %v1528_v1 = vrot.slane %v1527_v63, 2 }
 0x199   : > { %v1517_v2 = vrot.slane %v1516_v0, 1  ;;  %v1529_v3 = vadd.f32 %v1528_v1, %v1527_v63 }
 0x19b   : > { %v1530_v4 = vrot.slane %v1529_v3, 1  ;;  %v1518_v5 = vadd.f32 %v1517_v2, %v1516_v0 }
 0x19d   : > { %v1531_v6 = vadd.f32 %v1530_v4, %v1529_v3 }
 0x19f   : > { %v1533_v7 = vsel %vm1532_vm5, %v1518_v5, %v1531_v6 }
 0x1a0   : > { %v1534_v8 = vsel %vm500_vm0, %v1533_v7, 0.0 }
 0x1a1   : > { %1535 = vst [vmem:[%s465_s21] sm:$0xff] %v1534_v8 }
 0x1a2   : > { %s2692_s7 = sadd.s32 4294967295, %s2244_s25   ;;  %s1571_s26 = sshll.u32 %s2593_s14, 4  ;;  %s1572_s26 = int_to_ptr.vmem [resolvable:$true] %s1571_s26 }
 0x1a3   : > { %s1816_s12 = sshll.u32 %s2692_s7, 7  ;;  %s2248_s11 = smov 128  }
 0x1a4   : > { %s1554_s19 = scalar_lea.hbm %s2678_s4, %s1816_s12  ;;  %2043 = sst [smem:[#allocation10]] (%p2382_p11), %s2248_s11 }
 0x1a5   : > { %s2249_s16 = smov 2048   ;;  %s2250_s9 = smov 2  }
 0x1a6   : > { %2044 = sst [smem:[#allocation10 + $0x1]] (%p2382_p11), %s2249_s16  ;;  %s2251_s0 = smov 64  }
 0x1a7   : > { %2045 = sst [smem:[#allocation10 + $0x2]] (%p2382_p11), %s2250_s9  ;;  %s2252_s14 = smov 4  }
 0x1a8   : > { %2046 = sst [smem:[#allocation10 + $0x3]] (%p2382_p11), %s2251_s0  ;;  %s2253_s7 = smov [#allocation9]  }
 0x1a9   : > { %2047 = sst [smem:[#allocation10 + $0x4]] (%p2382_p11), %s2251_s0  ;;  %s2254_s29 = smov 0  }
 0x1aa   : > { %2048 = sst [smem:[#allocation10 + $0x5]] (%p2382_p11), %s2252_s14  ;;  %s2624_s16 = scalar_lea.hbm %s2679_s5, %s1816_s12 }
 0x1ab   : > { %2049 = dma.general (%p2382_p11), %s1572_s26, 256, %s1554_s19, %s1537_s27, %s2253_s7, [#allocation10], %s2254_s29, 0  }
 0x1ac   : > { %s1600_s1 = sshll.u32 %s465_s21, 4  ;;  %s2255_s0 = smov [#allocation7]   ;;  %s1601_s1 = int_to_ptr.vmem [resolvable:$true] %s1600_s1 }
 0x1ad   : > { %s2146_s9 = scalar_lea.vmem %s1601_s1, 128  ;;  %s2150_s2 = sshll.u32 %s2255_s0, 4  ;;  %s2151_s2 = int_to_ptr.vmem [resolvable:$false] %s2150_s2 }
 0x1ae   : > { %p2147_p5 = scmp.ne.s32.totalorder %s1601_s1, %s2146_s9  ;;  %s2152_s14 = scalar_lea.vmem %s2151_s2, 256 }
 0x1af   : > { %p2153_p8 = scmp.lt.s32.totalorder %s1601_s1, %s2151_s2  ;;  %p2154_p9 = scmp.lt.s32.totalorder %s2152_s14, %s2146_s9 }
 0x1b0   : > { %p2148_p6 = pnand %p2147_p5, %p2382_p11 }
 0x1b1   : > { %p2155_p10 = por %p2154_p9, %p2153_p8 }
 0x1b2   : > { %p2149_p7 = pneg %p2148_p6 }
 0x1b4   : > { %p2156_p12 = pnand %p2155_p10, %p2149_p7 }
 0x1b6   : > { %2159 = shalt.err (!%p2156_p12)
}
 0x1b7   : > { %s2160_s21 = scalar_lea.hbm %s2624_s16, 128  ;;  %s2164_s26 = scalar_lea.hbm %s2679_s5, 2048 }
 0x1b8   : > { %p2161_p13 = scmp.ne.s32.totalorder %s2624_s16, %s2160_s21  ;;  %p2165_p2 = scmp.lt.u32.totalorder %s2624_s16, %s2679_s5 }
 0x1b9   : > { %p2166_p3 = scmp.lt.u32.totalorder %s2164_s26, %s2160_s21  ;;  %p2168_p6 = scmp.lt.u32.totalorder %s2160_s21, %s2624_s16 }
 0x1ba   : > { %p2162_p4 = pnand %p2161_p13, %p2382_p11 }
 0x1bb   : > { %p2167_p5 = por %p2166_p3, %p2165_p2 }
 0x1bc   : > { %p2163_p0 = pneg %p2162_p4 }
 0x1bd   : > { %p2169_p7 = por %p2168_p6, %p2167_p5 }
 0x1bf   : > { %p2170_p8 = pnand %p2169_p7, %p2163_p0 }
 0x1c1   : > { %2173 = shalt.err (!%p2170_p8)
}
 0x1c2   : > { %s2693_s7 = scalar_lea.sflag [#allocation8], %s2420_s15 }
 0x1c3   : > { %2050 = dma.vmem_to_hbm [thread:$0]  (%p2382_p11), %s1601_s1, 128, %s2624_s16, %s2693_s7  }
 0x1c4 PF: > { %p2060_p9 = scmp.ge.s32.totalorder %s2244_s25, 2  ;;  %s1612_s29 = sand.u32 1, %s2216_s18  }
 0x1c5   : > { %s1613_s10 = scalar_lea.sflag [#allocation6], %s1612_s29 }
 0x1c6   : > { %p2054_p10 = pnand %p2060_p9, %p2388_p1 }
 0x1c8   : > { %2207 = dma.done.wait (!%p2054_p10), %s1613_s10, 256  }
 0x1c9   : > { %2209 = vsyncadd (!%p2054_p10), %s1613_s10, 4294967040  ;;  %s1622_s11 = scalar_lea.sflag [#allocation8], %s1612_s29 }
 0x1ca   : > { %2211 = dma.done.wait (!%p2054_p10), %s1622_s11, 128  }
 0x1cb   : > { %2213 = vsyncadd (!%p2054_p10), %s1622_s11, 4294967168  ;;  %p19_p11 = scmp.ge.s32.totalorder %s2329_s28, 18   ;;  %s2694_s18 = smov %s2236_s23 }
 0x1cc   : > { %s2695_s19 = smov %s2224_s20  ;;  %s2696_s20 = smov %s2371_s17 }
 0x1cd   : > { %s2697_s21 = smov %s2232_s22  ;;  %s2698_s22 = smov %s2357_s13 }
 0x1ce   : > { %s2699_s23 = smov %s2240_s24  ;;  %s2700_s24 = smov %s2340_s8 }
 0x1cf   : > { %s2701_s25 = smov %s2329_s28  ;;  %21 = sbr.rel (!%p19_p11) target bundleno = 11 (0xb), region = 248 }
 0x1d6   :  { %1627 = vsyncpa [#allocation6], 1 }
 0x1d7   :  { %1629 = vsyncpa [#allocation6 + $0x1], 1 }
 0x1d8   :  { %1630 = vsyncpa [#allocation8], 1 }
 0x1d9   :  { %1632 = vsyncpa [#allocation8 + $0x1], 1 }

</bundles_post_ra>
